<compile_context>
chip_gen: v6e
topology: v6e:2x2x1
jax: 0.10.0
libtpu: 0.0.40
codegen_flags: <defaults>
</compile_context>

<pallas_src>
import functools

import jax
import jax.numpy as jnp
from jax.experimental import pallas as pl
from jax.experimental.pallas import tpu as pltpu

HIDDEN = 512          # fixed by the PyTorch module
LANE = 128            # TPU lane granule


def _round_up(x, m):
    return ((x + m - 1) // m) * m


# ---------------------------------------------------------------------------
# Pallas kernel: Linear(+folded null-mix)/SiLU/Linear/SiLU/Linear.
# One grid step processes TILE_M rows; all weights stay resident in VMEM.
# ---------------------------------------------------------------------------
def _position_net_kernel(x_ref, mask_ref, w1_ref, nullh1_ref, b12_ref,
                         w2_ref, w3_ref, b3_ref, out_ref):
    m = mask_ref[...]                                     # (TM, 1) f32

    # Layer 1: bf16 MXU matmul, f32 accumulate; null-mix folded through w1:
    #   h = m * (x @ w1) + (1 - m) * (null @ w1) + b1   (linear-equivalent)
    xw = jnp.dot(x_ref[...], w1_ref[...],
                 preferred_element_type=jnp.float32)      # (TM, 512) f32
    h = m * xw + (1.0 - m) * nullh1_ref[...] + b12_ref[0:1, :]
    # SiLU in f32 (v5e-safe); divide goes to the EUP slot via approx recip.
    h = h * pl.reciprocal(1.0 + jnp.exp(-h), approx=True)

    # Layer 2
    h = jnp.dot(h.astype(jnp.bfloat16), w2_ref[...],
                preferred_element_type=jnp.float32) + b12_ref[1:2, :]
    h = h * pl.reciprocal(1.0 + jnp.exp(-h), approx=True)

    # Layer 3
    o = jnp.dot(h.astype(jnp.bfloat16), w3_ref[...],
                preferred_element_type=jnp.float32) + b3_ref[...]
    out_ref[...] = o.astype(out_ref.dtype)


# ---------------------------------------------------------------------------
# Glue: Fourier embedding (matches torch concat order: per-freq [sin4, cos4]).
# ---------------------------------------------------------------------------
def fourier_embed(x, num_freqs=8, temperature=100.0):
    freqs = temperature ** (jnp.arange(num_freqs, dtype=jnp.float32) / num_freqs)
    scaled = x[..., None, :] * freqs[:, None]                       # (..., F, 4)
    emb = jnp.concatenate([jnp.sin(scaled), jnp.cos(scaled)], -1)   # (..., F, 8)
    return emb.reshape(*x.shape[:-1], num_freqs * 2 * x.shape[-1])  # (..., F*8)


def pack_params(params):
    """One-time packing: fuse/pad params, cast weights to bf16, fold null@w1."""
    in_dim = params["null_pos"].shape[-1]
    position_dim = params["null_xyxy"].shape[-1]
    k1 = in_dim + position_dim
    k1p = _round_up(k1, LANE)
    out_dim = params["w3"].shape[-1]
    out_pad = _round_up(out_dim, LANE)

    null = jnp.concatenate([params["null_pos"], params["null_xyxy"]], -1)  # (1,k1)
    null_h1 = null.astype(jnp.float32) @ params["w1"].astype(jnp.float32)  # (1,512)

    return {
        "w1":  jnp.pad(params["w1"], ((0, k1p - k1), (0, 0))).astype(jnp.bfloat16),
        "null_h1": null_h1.astype(jnp.float32),
        "b12": jnp.concatenate([params["b1"], params["b2"]], 0).astype(jnp.float32),
        "w2":  params["w2"].astype(jnp.bfloat16),
        "w3":  jnp.pad(params["w3"], ((0, 0), (0, out_pad - out_dim))
                       ).astype(jnp.bfloat16),
        "b3":  jnp.pad(params["b3"], ((0, 0), (0, out_pad - out_dim))
                       ).astype(jnp.float32),
    }


@functools.lru_cache(maxsize=1)
def _max_tile_m():
    # v5e: 16 MiB scoped-VMEM default and a 4x128^2 MXU that is already busy
    # at TM=256 -> keep 256 there; v6e/v7x are step-overhead bound -> 512.
    try:
        kind = jax.devices()[0].device_kind.lower()
    except Exception:
        return 512
    if "v5 lite" in kind or "v5e" in kind or "v5lite" in kind:
        return 256
    return 512


def _choose_tile_m(M):
    """Row tile (multiple of 16 for bf16 sublane packing) and padded M.

    Small M -> single exact-size step (zero row padding; tiny calls are
    weight-DMA bound). Large M -> pick from {max_tile, 256, 128} minimizing
    row-padding waste, preferring the larger tile on ties (>= 2 grid steps so
    both v7x TensorCores get work under dimension_semantics=("parallel",)).
    """
    max_tile = _max_tile_m()
    m16 = _round_up(M, 16)
    if m16 <= max_tile:
        return m16, m16
    best_tile, best_pad = None, None
    for t in (max_tile, 256, 128):
        if t > max_tile:
            continue
        pad = _round_up(m16, t) - m16
        if best_pad is None or pad < best_pad:
            best_tile, best_pad = t, pad
    return best_tile, _round_up(m16, best_tile)


@functools.partial(jax.jit, static_argnames=("out_dim", "fourier_freqs", "out_dtype"))
def position_net_forward(boxes, masks, positive_embeddings, packed, *,
                         out_dim, fourier_freqs=8, out_dtype=jnp.bfloat16):
    B, N, in_dim = positive_embeddings.shape
    position_dim = fourier_freqs * 2 * 4
    k1 = in_dim + position_dim
    k1p = packed["w1"].shape[0]
    out_pad = packed["w3"].shape[1]
    M = B * N

    xyxy = fourier_embed(boxes.astype(jnp.float32), fourier_freqs)   # (B,N,pd)
    x = jnp.concatenate(
        [positive_embeddings.astype(jnp.float32), xyxy], axis=-1
    ).reshape(M, k1)

    tile_m, m_pad = _choose_tile_m(M)

    # Null-mix is folded through w1 inside the kernel, so x can ship in bf16.
    x = jnp.pad(x, ((0, m_pad - M), (0, k1p - k1))).astype(jnp.bfloat16)
    mask_2d = jnp.pad(masks.reshape(M, 1).astype(jnp.float32),
                      ((0, m_pad - M), (0, 0)))

    out_bytes = jnp.dtype(out_dtype).itemsize
    weight_elems = k1p * HIDDEN + HIDDEN * HIDDEN + HIDDEN * out_pad
    cost = pl.CostEstimate(
        flops=2 * m_pad * weight_elems,
        transcendentals=2 * m_pad * HIDDEN,
        bytes_accessed=(m_pad * k1p * 2 + m_pad * 4          # x (bf16), mask
                        + weight_elems * 2                   # bf16 weights
                        + (3 * HIDDEN + out_pad) * 4         # biases + null_h1
                        + m_pad * out_pad * out_bytes),      # output
    )

    # VMEM budget: single-buffered resident weights + double-buffered
    # activation/output tiles, 2x headroom for intermediates/spills.
    resident = weight_elems * 2 + (3 * HIDDEN + out_pad) * 4
    per_step = tile_m * (k1p * 2 + LANE * 4 + out_pad * out_bytes)
    vmem_limit = int(min(max(2 * (resident + 2 * per_step) + (4 << 20), 16 << 20),
                         64 << 20))

    def resident_spec(shape):
        # Constant index_map + single buffer: weights stay resident in VMEM
        # across grid steps without a useless double buffer.
        return pl.BlockSpec(shape, lambda i: (0, 0), pipeline_mode=pl.Buffered(1))

    out = pl.pallas_call(
        _position_net_kernel,
        out_shape=jax.ShapeDtypeStruct((m_pad, out_pad), out_dtype),
        grid_spec=pltpu.PrefetchScalarGridSpec(
            num_scalar_prefetch=0,
            grid=(m_pad // tile_m,),
            in_specs=[
                pl.BlockSpec((tile_m, k1p), lambda i: (i, 0)),   # x  (bf16)
                pl.BlockSpec((tile_m, 1), lambda i: (i, 0)),     # mask (f32)
                resident_spec((k1p, HIDDEN)),                    # w1  (bf16)
                resident_spec((1, HIDDEN)),                      # null@w1 (f32)
                resident_spec((2, HIDDEN)),                      # b1|b2 (f32)
                resident_spec((HIDDEN, HIDDEN)),                 # w2  (bf16)
                resident_spec((HIDDEN, out_pad)),                # w3  (bf16)
                resident_spec((1, out_pad)),                     # b3  (f32)
            ],
            out_specs=pl.BlockSpec((tile_m, out_pad), lambda i: (i, 0)),
        ),
        compiler_params=pltpu.CompilerParams(
            dimension_semantics=("parallel",),
            vmem_limit_bytes=vmem_limit),
        cost_estimate=cost,
    )(x, mask_2d, packed["w1"], packed["null_h1"], packed["b12"],
      packed["w2"], packed["w3"], packed["b3"])

    return out[:M, :out_dim].reshape(B, N, out_dim)


# ---------------------------------------------------------------------------
# Pure-JAX f32 reference (mirrors the PyTorch forward exactly).
# ---------------------------------------------------------------------------
def position_net_reference(boxes, masks, positive_embeddings, params,
                           fourier_freqs=8):
    m = masks[..., None].astype(jnp.float32)
    xyxy = fourier_embed(boxes.astype(jnp.float32), fourier_freqs)
    pos = positive_embeddings * m + (1.0 - m) * params["null_pos"][0]
    xyxy = xyxy * m + (1.0 - m) * params["null_xyxy"][0]
    x = jnp.concatenate([pos, xyxy], axis=-1)
    h = x @ params["w1"] + params["b1"][0]
    h = h * jax.nn.sigmoid(h)
    h = h @ params["w2"] + params["b2"][0]
    h = h * jax.nn.sigmoid(h)
    return h @ params["w3"] + params["b3"][0]


def init_params(key, in_dim, out_dim, fourier_freqs=8):
    position_dim = fourier_freqs * 2 * 4
    k1 = in_dim + position_dim
    ks = jax.random.split(key, 8)
    scale = 0.02
    return {
        # null features are zeros at PyTorch init; use small randoms here so
        # the (1 - mask) * null path is actually exercised numerically.
        "null_pos":  scale * jax.random.normal(ks[0], (1, in_dim), jnp.float32),
        "null_xyxy": scale * jax.random.normal(ks[1], (1, position_dim), jnp.float32),
        "w1": scale * jax.random.normal(ks[2], (k1, HIDDEN), jnp.float32),
        "b1": scale * jax.random.normal(ks[3], (1, HIDDEN), jnp.float32),
        "w2": scale * jax.random.normal(ks[4], (HIDDEN, HIDDEN), jnp.float32),
        "b2": scale * jax.random.normal(ks[5], (1, HIDDEN), jnp.float32),
        "w3": scale * jax.random.normal(ks[6], (HIDDEN, out_dim), jnp.float32),
        "b3": scale * jax.random.normal(ks[7], (1, out_dim), jnp.float32),
    }


if __name__ == "__main__":
    B, N = 2, 8
    in_dim, out_dim, fourier_freqs = 64, 128, 8

    key = jax.random.PRNGKey(0)
    k_box, k_mask, k_emb, k_par = jax.random.split(key, 4)

    boxes = jax.random.uniform(k_box, (B, N, 4), jnp.float32)
    masks = jax.random.bernoulli(k_mask, 0.5, (B, N)).astype(jnp.float32)
    positive_embeddings = jax.random.normal(k_emb, (B, N, in_dim), jnp.float32)

    params = init_params(k_par, in_dim, out_dim, fourier_freqs)
    packed = pack_params(params)

    objs = position_net_forward(boxes, masks, positive_embeddings, packed,
                                out_dim=out_dim, fourier_freqs=fourier_freqs)
    jax.block_until_ready(objs)
    assert objs.shape == (B, N, out_dim)

    ref = position_net_reference(boxes, masks, positive_embeddings, params,
                                 fourier_freqs)
    # bf16 matmul operands + bf16 output -> relaxed tolerance vs f32 reference.
    assert jnp.allclose(objs.astype(jnp.float32), ref, atol=2e-2, rtol=2e-2), \
        "mismatch vs reference"

    print("KERNEL_OK")
</pallas_src>

<mosaic_0001>
module attributes {stable_mosaic.version = 11 : i64} {
  func.func @_position_net_kernel(%arg0: i32, %arg1: memref<16x128xbf16, #tpu.memory_space<vmem>>, %arg2: memref<16x1xf32, #tpu.memory_space<vmem>>, %arg3: memref<128x512xbf16, #tpu.memory_space<vmem>>, %arg4: memref<1x512xf32, #tpu.memory_space<vmem>>, %arg5: memref<2x512xf32, #tpu.memory_space<vmem>>, %arg6: memref<512x512xbf16, #tpu.memory_space<vmem>>, %arg7: memref<512x128xbf16, #tpu.memory_space<vmem>>, %arg8: memref<1x128xf32, #tpu.memory_space<vmem>>, %arg9: memref<16x128xbf16, #tpu.memory_space<vmem>>) attributes {dimension_semantics = [#tpu.dimension_semantics<parallel>], iteration_bounds = array<i64: 1>, scalar_prefetch = 0 : i64, scratch_operands = 0 : i64, tpu.core_type = #tpu.core_type<tc>, window_params = [{transform_indices = @transform_0, window_bounds = array<i64: 16, 128>}, {transform_indices = @transform_1, window_bounds = array<i64: 16, 1>}, {pipeline_mode = #tpu.pipeline_mode<synchronous>, transform_indices = @transform_2, window_bounds = array<i64: 128, 512>}, {pipeline_mode = #tpu.pipeline_mode<synchronous>, transform_indices = @transform_3, window_bounds = array<i64: 1, 512>}, {pipeline_mode = #tpu.pipeline_mode<synchronous>, transform_indices = @transform_4, window_bounds = array<i64: 2, 512>}, {pipeline_mode = #tpu.pipeline_mode<synchronous>, transform_indices = @transform_5, window_bounds = array<i64: 512, 512>}, {pipeline_mode = #tpu.pipeline_mode<synchronous>, transform_indices = @transform_6, window_bounds = array<i64: 512, 128>}, {pipeline_mode = #tpu.pipeline_mode<synchronous>, transform_indices = @transform_7, window_bounds = array<i64: 1, 128>}, {transform_indices = @transform_8, window_bounds = array<i64: 16, 128>}]} {
    %c0 = arith.constant 0 : index
    %c0_0 = arith.constant 0 : index
    %0 = vector.load %arg2[%c0, %c0_0] : memref<16x1xf32, #tpu.memory_space<vmem>>, vector<16x1xf32>
    %c0_1 = arith.constant 0 : index
    %c0_2 = arith.constant 0 : index
    %1 = vector.load %arg1[%c0_1, %c0_2] : memref<16x128xbf16, #tpu.memory_space<vmem>>, vector<16x128xbf16>
    %c0_3 = arith.constant 0 : index
    %c0_4 = arith.constant 0 : index
    %2 = vector.load %arg3[%c0_3, %c0_4] : memref<128x512xbf16, #tpu.memory_space<vmem>>, vector<128x512xbf16>
    %cst = arith.constant dense<0.000000e+00> : vector<16x512xf32>
    %3 = tpu.matmul %1, %2, %cst {dimension_numbers = #tpu.dot_dimension_numbers<[1], [0], [0], [1], [0, 0, 1, 1], [], []>} : vector<16x128xbf16>, vector<128x512xbf16>, vector<16x512xf32> -> vector<16x512xf32>
    %4 = vector.broadcast %0 : vector<16x1xf32> to vector<16x512xf32>
    %5 = arith.mulf %4, %3 : vector<16x512xf32>
    %cst_5 = arith.constant 1.000000e+00 : f32
    %6 = vector.broadcast %cst_5 : f32 to vector<16x1xf32>
    %7 = arith.subf %6, %0 : vector<16x1xf32>
    %c0_6 = arith.constant 0 : index
    %c0_7 = arith.constant 0 : index
    %8 = vector.load %arg4[%c0_6, %c0_7] : memref<1x512xf32, #tpu.memory_space<vmem>>, vector<1x512xf32>
    %9 = vector.broadcast %7 : vector<16x1xf32> to vector<16x512xf32>
    %10 = vector.broadcast %8 : vector<1x512xf32> to vector<16x512xf32>
    %11 = arith.mulf %9, %10 : vector<16x512xf32>
    %12 = arith.addf %5, %11 : vector<16x512xf32>
    %c0_8 = arith.constant 0 : index
    %c0_9 = arith.constant 0 : index
    %13 = vector.load %arg5[%c0_8, %c0_9] : memref<2x512xf32, #tpu.memory_space<vmem>>, vector<1x512xf32>
    %14 = vector.broadcast %13 : vector<1x512xf32> to vector<16x512xf32>
    %15 = arith.addf %12, %14 : vector<16x512xf32>
    %cst_10 = arith.constant 0.000000e+00 : f32
    %16 = vector.broadcast %cst_10 : f32 to vector<16x512xf32>
    %17 = arith.subf %16, %15 : vector<16x512xf32>
    %18 = math.exp %17 : vector<16x512xf32>
    %cst_11 = arith.constant 1.000000e+00 : f32
    %19 = vector.broadcast %cst_11 : f32 to vector<16x512xf32>
    %20 = arith.addf %19, %18 : vector<16x512xf32>
    %21 = tpu.reciprocal %20 {approx = true} : vector<16x512xf32> -> vector<16x512xf32>
    %22 = arith.mulf %15, %21 : vector<16x512xf32>
    %23 = arith.truncf %22 : vector<16x512xf32> to vector<16x512xbf16>
    %c0_12 = arith.constant 0 : index
    %c0_13 = arith.constant 0 : index
    %24 = vector.load %arg6[%c0_12, %c0_13] : memref<512x512xbf16, #tpu.memory_space<vmem>>, vector<512x512xbf16>
    %cst_14 = arith.constant dense<0.000000e+00> : vector<16x512xf32>
    %25 = tpu.matmul %23, %24, %cst_14 {dimension_numbers = #tpu.dot_dimension_numbers<[1], [0], [0], [1], [0, 0, 1, 1], [], []>} : vector<16x512xbf16>, vector<512x512xbf16>, vector<16x512xf32> -> vector<16x512xf32>
    %c1 = arith.constant 1 : index
    %c0_15 = arith.constant 0 : index
    %26 = vector.load %arg5[%c1, %c0_15] : memref<2x512xf32, #tpu.memory_space<vmem>>, vector<1x512xf32>
    %27 = vector.broadcast %26 : vector<1x512xf32> to vector<16x512xf32>
    %28 = arith.addf %25, %27 : vector<16x512xf32>
    %cst_16 = arith.constant 0.000000e+00 : f32
    %29 = vector.broadcast %cst_16 : f32 to vector<16x512xf32>
    %30 = arith.subf %29, %28 : vector<16x512xf32>
    %31 = math.exp %30 : vector<16x512xf32>
    %cst_17 = arith.constant 1.000000e+00 : f32
    %32 = vector.broadcast %cst_17 : f32 to vector<16x512xf32>
    %33 = arith.addf %32, %31 : vector<16x512xf32>
    %34 = tpu.reciprocal %33 {approx = true} : vector<16x512xf32> -> vector<16x512xf32>
    %35 = arith.mulf %28, %34 : vector<16x512xf32>
    %36 = arith.truncf %35 : vector<16x512xf32> to vector<16x512xbf16>
    %c0_18 = arith.constant 0 : index
    %c0_19 = arith.constant 0 : index
    %37 = vector.load %arg7[%c0_18, %c0_19] : memref<512x128xbf16, #tpu.memory_space<vmem>>, vector<512x128xbf16>
    %cst_20 = arith.constant dense<0.000000e+00> : vector<16x128xf32>
    %38 = tpu.matmul %36, %37, %cst_20 {dimension_numbers = #tpu.dot_dimension_numbers<[1], [0], [0], [1], [0, 0, 1, 1], [], []>} : vector<16x512xbf16>, vector<512x128xbf16>, vector<16x128xf32> -> vector<16x128xf32>
    %c0_21 = arith.constant 0 : index
    %c0_22 = arith.constant 0 : index
    %39 = vector.load %arg8[%c0_21, %c0_22] : memref<1x128xf32, #tpu.memory_space<vmem>>, vector<1x128xf32>
    %40 = vector.broadcast %39 : vector<1x128xf32> to vector<16x128xf32>
    %41 = arith.addf %38, %40 : vector<16x128xf32>
    %42 = arith.truncf %41 : vector<16x128xf32> to vector<16x128xbf16>
    %c0_23 = arith.constant 0 : index
    %c0_24 = arith.constant 0 : index
    %43 = vector.load %arg9[%c0_23, %c0_24] : memref<16x128xbf16, #tpu.memory_space<vmem>>, vector<16x128xbf16>
    tpu.vector_store %arg9[%c0_23, %c0_24], %42 {strides = array<i32>} : memref<16x128xbf16, #tpu.memory_space<vmem>>, vector<16x128xbf16>,
    return
  }
  func.func @transform_0(%arg0: i32) -> (i32, i32) {
    %c0_i32 = arith.constant 0 : i32
    %c0_i32_0 = arith.constant 0 : i32
    return %arg0, %c0_i32 : i32, i32
  }
  func.func @transform_1(%arg0: i32) -> (i32, i32) {
    %c0_i32 = arith.constant 0 : i32
    %c0_i32_0 = arith.constant 0 : i32
    return %arg0, %c0_i32 : i32, i32
  }
  func.func @transform_2(%arg0: i32) -> (i32, i32) {
    %c0_i32 = arith.constant 0 : i32
    %c0_i32_0 = arith.constant 0 : i32
    %c0_i32_1 = arith.constant 0 : i32
    return %c0_i32, %c0_i32_0 : i32, i32
  }
  func.func @transform_3(%arg0: i32) -> (i32, i32) {
    %c0_i32 = arith.constant 0 : i32
    %c0_i32_0 = arith.constant 0 : i32
    %c0_i32_1 = arith.constant 0 : i32
    return %c0_i32, %c0_i32_0 : i32, i32
  }
  func.func @transform_4(%arg0: i32) -> (i32, i32) {
    %c0_i32 = arith.constant 0 : i32
    %c0_i32_0 = arith.constant 0 : i32
    %c0_i32_1 = arith.constant 0 : i32
    return %c0_i32, %c0_i32_0 : i32, i32
  }
  func.func @transform_5(%arg0: i32) -> (i32, i32) {
    %c0_i32 = arith.constant 0 : i32
    %c0_i32_0 = arith.constant 0 : i32
    %c0_i32_1 = arith.constant 0 : i32
    return %c0_i32, %c0_i32_0 : i32, i32
  }
  func.func @transform_6(%arg0: i32) -> (i32, i32) {
    %c0_i32 = arith.constant 0 : i32
    %c0_i32_0 = arith.constant 0 : i32
    %c0_i32_1 = arith.constant 0 : i32
    return %c0_i32, %c0_i32_0 : i32, i32
  }
  func.func @transform_7(%arg0: i32) -> (i32, i32) {
    %c0_i32 = arith.constant 0 : i32
    %c0_i32_0 = arith.constant 0 : i32
    %c0_i32_1 = arith.constant 0 : i32
    return %c0_i32, %c0_i32_0 : i32, i32
  }
  func.func @transform_8(%arg0: i32) -> (i32, i32) {
    %c0_i32 = arith.constant 0 : i32
    %c0_i32_0 = arith.constant 0 : i32
    return %arg0, %c0_i32 : i32, i32
  }
}

</mosaic_0001>

<bundles_post_ra>
// kernel: position_net_forward.1
= control target key start
LH: loop header
LB: loop body
LE: loop exit
PB: predicated region body
PF: predicated region fallthrough
CT: control target
= control target key end

     0   :  { %13 = vsyncpa [#allocation3], 0  ;;  %s2775_s0 = inlined_call_operand.vmem [shape: bf16[16,128], index: 0, kind: input, shape index: {}]   ;;  %s2776_s1 = inlined_call_operand.vmem [shape: f32[16,1], index: 1, kind: input, shape index: {}]   ;;  %s2777_s2 = inlined_call_operand.vmem [shape: bf16[128,512], index: 2, kind: input, shape index: {}]   ;;  %s2778_s3 = inlined_call_operand.vmem [shape: f32[1,512], index: 3, kind: input, shape index: {}]   ;;  %s2779_s4 = inlined_call_operand.vmem [shape: f32[2,512], index: 4, kind: input, shape index: {}]   ;;  %s2780_s5 = inlined_call_operand.hbm [shape: bf16[512,512], index: 5, kind: input, shape index: {}]   ;;  %s2781_s6 = inlined_call_operand.hbm [shape: bf16[512,128], index: 6, kind: input, shape index: {}]   ;;  %s2782_s7 = inlined_call_operand.vmem [shape: f32[1,128], index: 7, kind: input, shape index: {}]   ;;  %s2783_s8 = inlined_call_operand.hbm [shape: bf16[16,128], index: 8, kind: output, shape index: {}]  }
   0x1   :  { %14 = vsyncpa [#allocation6], 0 }
   0x2   :  { %15 = vsyncpa [#allocation4], 0  ;;  %s2546_s27 = smov [#allocation2]  }
   0x3   :  { %s31_s28 = sshll.u32 %s2546_s27, 4  ;;  %s32_s28 = int_to_ptr.vmem [resolvable:$true] %s31_s28 }
   0x4   :  { %s2488_s29 = scalar_lea.vmem %s32_s28, 16384  ;;  %p2493_p1 = scmp.lt.s32.totalorder %s32_s28, %s32_s28 }
   0x5   :  { %p2489_p0 = scmp.ne.s32.totalorder %s32_s28, %s2488_s29  ;;  %p2494_p2 = scmp.lt.s32.totalorder %s2488_s29, %s2488_s29 }
   0x7   :  { %p2495_p3 = por %p2494_p2, %p2493_p1 }
   0x9   :  { %p2496_p4 = pnand %p2495_p3, %p2489_p0 }
   0xb   :  { %2499 = shalt.err (!%p2496_p4)
}
   0xc   :  { %s2547_s30 = smov 256   ;;  %s2548_s9 = smov 16  }
   0xd   :  { %37 = dma.hbm_to_vmem [thread:$0]  %s2780_s5, 16384, %s32_s28, [#allocation3], %s2547_s30, %s2547_s30, %s2548_s9  }
   0xe   :  { %s2549_s12 = smov [#allocation5]  }
   0xf   :  { %s43_s13 = sshll.u32 %s2549_s12, 4  ;;  %s44_s13 = int_to_ptr.vmem [resolvable:$true] %s43_s13 }
  0x10   :  { %s2508_s14 = scalar_lea.vmem %s44_s13, 4096  ;;  %p2513_p6 = scmp.lt.s32.totalorder %s44_s13, %s44_s13 }
  0x11   :  { %p2509_p5 = scmp.ne.s32.totalorder %s44_s13, %s2508_s14  ;;  %p2514_p7 = scmp.lt.s32.totalorder %s2508_s14, %s2508_s14 }
  0x13   :  { %p2515_p8 = por %p2514_p7, %p2513_p6 }
  0x15   :  { %p2516_p9 = pnand %p2515_p8, %p2509_p5 }
  0x17   :  { %2519 = shalt.err (!%p2516_p9)
}
  0x18   :  { %s2550_s15 = smov 64   ;;  %s2551_s16 = smov 4  }
  0x19   :  { %49 = dma.hbm_to_vmem [thread:$0]  %s2781_s6, 4096, %s44_s13, [#allocation6], %s2550_s15, %s2550_s15, %s2551_s16  }
  0x1a   :  { %2540 = dma.done.wait [#allocation3], 16384  }
  0x1b   :  { %2541 = vsyncadd [#allocation3], 4294950912 }
  0x1c   :  { %2542 = dma.done.wait [#allocation6], 4096  }
  0x1d   :  { %2543 = vsyncadd [#allocation6], 4294963200  ;;  %v2552_v0 = vmov 0   ;;  %v2143_v1 = vld [vmem:[%s2777_s2 + $0xe4] ss:$16 sps:$4 sm:$0xff]   ;;  %v60_v30 = vld [vmem:[%s2776_s1 + $0x8] sm:$0xff] }
  0x1e   :  { %293 = vmatprep.mubr.bf16.mxu0 %v2552_v0  ;;  %336 = vmatprep.mubr.bf16.mxu1 %v2552_v0  ;;  %v2145_v2 = vld [vmem:[%s2777_s2 + $0xec] ss:$16 sps:$4 sm:$0xff]   ;;  %v2147_v3 = vld [vmem:[%s2777_s2 + $0xe0] ss:$16 sps:$4 sm:$0xff]   ;;  %v2148_v4 = vld [vmem:[%s2777_s2 + $0xe8] ss:$16 sps:$4 sm:$0xff]  }
  0x1f   :  { %2142 = vset.pattern.permute.xlu1 %v2552_v0  ;;  %2141 = vset.pattern.permute.xlu0 %v2552_v0  ;;  %v2149_v5 = vld [vmem:[%s2777_s2 + $0xc4] ss:$16 sps:$4 sm:$0xff]   ;;  %v2151_v6 = vld [vmem:[%s2777_s2 + $0xcc] ss:$16 sps:$4 sm:$0xff]   ;;  %v2153_v7 = vld [vmem:[%s2777_s2 + $0xc0] ss:$16 sps:$4 sm:$0xff]  }
  0x20   :  { %261 = vmatprep.subr.bf16.mxu0 %v2143_v1  ;;  %304 = vmatprep.subr.bf16.mxu1 %v2145_v2  ;;  %v2154_v8 = vld [vmem:[%s2777_s2 + $0xc8] ss:$16 sps:$4 sm:$0xff]   ;;  %v2155_v9 = vld [vmem:[%s2777_s2 + $0xa4] ss:$16 sps:$4 sm:$0xff]   ;;  %v2157_v10 = vld [vmem:[%s2777_s2 + $0xac] ss:$16 sps:$4 sm:$0xff]  }
  0x21   :  { %262 = vmatpush1.bf16.msra.mxu0 %v2147_v3  ;;  %305 = vmatpush1.bf16.msra.mxu1 %v2148_v4  ;;  %v2159_v11 = vld [vmem:[%s2777_s2 + $0xa0] ss:$16 sps:$4 sm:$0xff]   ;;  %v2160_v12 = vld [vmem:[%s2777_s2 + $0xa8] ss:$16 sps:$4 sm:$0xff]   ;;  %v2161_v13 = vld [vmem:[%s2777_s2 + $0x84] ss:$16 sps:$4 sm:$0xff]  }
  0x22   :  { %263 = vmatprep.subr.bf16.mxu0 %v2149_v5  ;;  %306 = vmatprep.subr.bf16.mxu1 %v2151_v6  ;;  %v2163_v14 = vld [vmem:[%s2777_s2 + $0x8c] ss:$16 sps:$4 sm:$0xff]   ;;  %v2165_v15 = vld [vmem:[%s2777_s2 + $0x80] ss:$16 sps:$4 sm:$0xff]   ;;  %v2166_v16 = vld [vmem:[%s2777_s2 + $0x88] ss:$16 sps:$4 sm:$0xff]  }
  0x23   :  { %v2167_v17 = vld [vmem:[%s2777_s2 + $0x64] ss:$16 sps:$4 sm:$0xff]   ;;  %v2169_v18 = vld [vmem:[%s2777_s2 + $0x6c] ss:$16 sps:$4 sm:$0xff]   ;;  %v2171_v19 = vld [vmem:[%s2777_s2 + $0x60] ss:$16 sps:$4 sm:$0xff]  }
  0x24   :  { %v2172_v20 = vld [vmem:[%s2777_s2 + $0x68] ss:$16 sps:$4 sm:$0xff]   ;;  %v2173_v21 = vld [vmem:[%s2777_s2 + $0x44] ss:$16 sps:$4 sm:$0xff]   ;;  %v2175_v22 = vld [vmem:[%s2777_s2 + $0x4c] ss:$16 sps:$4 sm:$0xff]  }
  0x25   :  { %264 = vmatpush1.bf16.msra.mxu0 %v2153_v7  ;;  %307 = vmatpush1.bf16.msra.mxu1 %v2154_v8  ;;  %v2177_v23 = vld [vmem:[%s2777_s2 + $0x40] ss:$16 sps:$4 sm:$0xff]   ;;  %v2178_v24 = vld [vmem:[%s2777_s2 + $0x48] ss:$16 sps:$4 sm:$0xff]   ;;  %v2179_v25 = vld [vmem:[%s2777_s2 + $0x24] ss:$16 sps:$4 sm:$0xff]  }
  0x26   :  { %265 = vmatprep.subr.bf16.mxu0 %v2155_v9  ;;  %308 = vmatprep.subr.bf16.mxu1 %v2157_v10  ;;  %v2181_v26 = vld [vmem:[%s2777_s2 + $0x2c] ss:$16 sps:$4 sm:$0xff]   ;;  %v2183_v27 = vld [vmem:[%s2777_s2 + $0x20] ss:$16 sps:$4 sm:$0xff]   ;;  %v2184_v31 = vld [vmem:[%s2777_s2 + $0x28] ss:$16 sps:$4 sm:$0xff]  }
  0x27   :  { %v59_v28 = vld [vmem:[%s2776_s1] sm:$0xff]  ;;  %v2187_v33 = vld [vmem:[%s2777_s2 + $0xc] ss:$16 sps:$4 sm:$0xff]   ;;  %v366_v34 = vsub.f32 1.0, %v60_v30  ;;  %v2190_v36 = vld [vmem:[%s2777_s2 + $0x8] ss:$16 sps:$4 sm:$0xff]  }
  0x28   :  { %349 = vperm.xlu0 %2141, %v59_v28   ;;  %v365_v29 = vsub.f32 1.0, %v59_v28  ;;  %v2185_v32 = vld [vmem:[%s2777_s2 + $0x4] ss:$16 sps:$4 sm:$0xff]   ;;  %v2189_v35 = vld [vmem:[%s2777_s2] ss:$16 sps:$4 sm:$0xff]   ;;  %s2553_s24 = smov [#allocation7]  }
  0x29   :  { %266 = vmatpush1.bf16.msra.mxu0 %v2159_v11  ;;  %309 = vmatpush1.bf16.msra.mxu1 %v2160_v12  ;;  %v2194_v37 = vld [vmem:[#allocation2 + $0xe4] ss:$16 sps:$4 sm:$0xff]   ;;  %v2192_v40 = vld [vmem:[#allocation2 + $0xe0] ss:$16 sps:$4 sm:$0xff]   ;;  %s1872_s25 = sshll.u32 %s2553_s24, 4  ;;  %s1873_s25 = int_to_ptr.vmem [resolvable:$true] %s1872_s25 }
  0x2a   :  { %267 = vmatprep.subr.bf16.mxu0 %v2161_v13  ;;  %310 = vmatprep.subr.bf16.mxu1 %v2163_v14  ;;  %v2197_v38 = vld [vmem:[#allocation2 + $0x2e4] ss:$16 sps:$4 sm:$0xff]   ;;  %v2195_v41 = vld [vmem:[#allocation2 + $0x2e0] ss:$16 sps:$4 sm:$0xff]   ;;  %s2520_s26 = scalar_lea.vmem %s1873_s25, 128  ;;  %p2525_p11 = scmp.lt.s32.totalorder %s1873_s25, %s1873_s25 }
  0x2b   :  { %370 = vperm.xlu1 %2142, %v365_v29   ;;  %v2191_v39 = vld [vmem:[%s2775_s0] sm:$0xff]   ;;  %p2521_p10 = scmp.ne.s32.totalorder %s1873_s25, %s2520_s26  ;;  %p2526_p12 = scmp.lt.s32.totalorder %s2520_s26, %s2520_s26 }
  0x2c   :  { %354 = vperm.xlu0 %2141, %v60_v30   ;;  %v2200_v42 = vld [vmem:[#allocation2 + $0xc4] ss:$16 sps:$4 sm:$0xff]   ;;  %v2198_v44 = vld [vmem:[#allocation2 + $0xc0] ss:$16 sps:$4 sm:$0xff]  }
  0x2d   :  { %268 = vmatpush1.bf16.msra.mxu0 %v2165_v15  ;;  %311 = vmatpush1.bf16.msra.mxu1 %v2166_v16  ;;  %v2203_v43 = vld [vmem:[#allocation2 + $0x2c4] ss:$16 sps:$4 sm:$0xff]   ;;  %v2201_v45 = vld [vmem:[#allocation2 + $0x2c0] ss:$16 sps:$4 sm:$0xff]   ;;  %p2527_p13 = por %p2526_p12, %p2525_p11 }
  0x2e   :  { %269 = vmatprep.subr.bf16.mxu0 %v2167_v17  ;;  %312 = vmatprep.subr.bf16.mxu1 %v2169_v18  ;;  %v2206_v46 = vld [vmem:[#allocation2 + $0xa4] ss:$16 sps:$4 sm:$0xff]   ;;  %v2204_v48 = vld [vmem:[#allocation2 + $0xa0] ss:$16 sps:$4 sm:$0xff]  }
  0x2f   :  { %375 = vperm.xlu1 %2142, %v366_v34   ;;  %v2209_v47 = vld [vmem:[#allocation2 + $0x2a4] ss:$16 sps:$4 sm:$0xff]   ;;  %v2207_v49 = vld [vmem:[#allocation2 + $0x2a0] ss:$16 sps:$4 sm:$0xff]   ;;  %p2528_p0 = pnand %p2527_p13, %p2521_p10 }
  0x30   :  { %v2212_v50 = vld [vmem:[#allocation2 + $0x84] ss:$16 sps:$4 sm:$0xff]   ;;  %v2210_v52 = vld [vmem:[#allocation2 + $0x80] ss:$16 sps:$4 sm:$0xff]  }
  0x31   :  { %270 = vmatpush1.bf16.msra.mxu0 %v2171_v19  ;;  %313 = vmatpush1.bf16.msra.mxu1 %v2172_v20  ;;  %v2215_v51 = vld [vmem:[#allocation2 + $0x284] ss:$16 sps:$4 sm:$0xff]   ;;  %v2213_v53 = vld [vmem:[#allocation2 + $0x280] ss:$16 sps:$4 sm:$0xff]  }
  0x32   :  { %271 = vmatprep.subr.bf16.mxu0 %v2173_v21  ;;  %314 = vmatprep.subr.bf16.mxu1 %v2175_v22  ;;  %v2218_v54 = vld [vmem:[#allocation2 + $0x64] ss:$16 sps:$4 sm:$0xff]   ;;  %v2216_v55 = vld [vmem:[#allocation2 + $0x60] ss:$16 sps:$4 sm:$0xff]  }
  0x33   :  { %v2219_v56 = vld [vmem:[#allocation2 + $0x260] ss:$16 sps:$4 sm:$0xff]   ;;  %v2221_v57 = vld [vmem:[#allocation2 + $0x264] ss:$16 sps:$4 sm:$0xff]  }
  0x34   :  { %v2224_v58 = vld [vmem:[#allocation2 + $0x44] ss:$16 sps:$4 sm:$0xff]   ;;  %v2222_v60 = vld [vmem:[#allocation2 + $0x40] ss:$16 sps:$4 sm:$0xff]  }
  0x35   :  { %272 = vmatpush1.bf16.msra.mxu0 %v2177_v23  ;;  %315 = vmatpush1.bf16.msra.mxu1 %v2178_v24  ;;  %v2227_v59 = vld [vmem:[#allocation2 + $0x244] ss:$16 sps:$4 sm:$0xff]   ;;  %v2225_v61 = vld [vmem:[#allocation2 + $0x240] ss:$16 sps:$4 sm:$0xff]  }
  0x36   :  { %273 = vmatprep.subr.bf16.mxu0 %v2179_v25  ;;  %316 = vmatprep.subr.bf16.mxu1 %v2181_v26  ;;  %v2230_v62 = vld [vmem:[#allocation2 + $0x24] ss:$16 sps:$4 sm:$0xff]   ;;  %v2228_v0 = vld [vmem:[#allocation2 + $0x20] ss:$16 sps:$4 sm:$0xff]  }
  0x37   :  { %v2233_v63 = vld [vmem:[#allocation2 + $0x224] ss:$16 sps:$4 sm:$0xff]   ;;  %v2231_v1 = vld [vmem:[#allocation2 + $0x220] ss:$16 sps:$4 sm:$0xff]  }
  0x38   :  { %v2236_v2 = vld [vmem:[#allocation2 + $0x4] ss:$16 sps:$4 sm:$0xff]   ;;  %v2234_v4 = vld [vmem:[#allocation2] ss:$16 sps:$4 sm:$0xff]  }
  0x39   :  { %274 = vmatpush1.bf16.msra.mxu0 %v2183_v27  ;;  %317 = vmatpush1.bf16.msra.mxu1 %v2184_v31  ;;  %v2239_v3 = vld [vmem:[#allocation2 + $0x204] ss:$16 sps:$4 sm:$0xff]   ;;  %v2237_v5 = vld [vmem:[#allocation2 + $0x200] ss:$16 sps:$4 sm:$0xff]  }
  0x3a   :  { %275 = vmatprep.subr.bf16.mxu0 %v2185_v32  ;;  %318 = vmatprep.subr.bf16.mxu1 %v2187_v33  ;;  %v2242_v6 = vld [vmem:[#allocation2 + $0x1e4] ss:$16 sps:$4 sm:$0xff]   ;;  %v2240_v8 = vld [vmem:[#allocation2 + $0x1e0] ss:$16 sps:$4 sm:$0xff]  }
  0x3b   :  { %v2245_v7 = vld [vmem:[#allocation2 + $0x3e4] ss:$16 sps:$4 sm:$0xff]   ;;  %v2243_v9 = vld [vmem:[#allocation2 + $0x3e0] ss:$16 sps:$4 sm:$0xff]  }
  0x3c   :  { %v2248_v10 = vld [vmem:[#allocation2 + $0x1c4] ss:$16 sps:$4 sm:$0xff]   ;;  %v2246_v12 = vld [vmem:[#allocation2 + $0x1c0] ss:$16 sps:$4 sm:$0xff]  }
  0x3d   :  { %276 = vmatpush1.bf16.msra.mxu0 %v2189_v35  ;;  %319 = vmatpush1.bf16.msra.mxu1 %v2190_v36  ;;  %v2251_v11 = vld [vmem:[#allocation2 + $0x3c4] ss:$16 sps:$4 sm:$0xff]   ;;  %v2249_v13 = vld [vmem:[#allocation2 + $0x3c0] ss:$16 sps:$4 sm:$0xff]  }
  0x3e   :  { %1288 = vmatprep.subr.bf16.mxu0 %v2194_v37  ;;  %1331 = vmatprep.subr.bf16.mxu1 %v2197_v38  ;;  %v2254_v14 = vld [vmem:[#allocation2 + $0x1a4] ss:$16 sps:$4 sm:$0xff]   ;;  %v2252_v16 = vld [vmem:[#allocation2 + $0x1a0] ss:$16 sps:$4 sm:$0xff]   ;;  %v2290_v38 = vld [vmem:[#allocation2 + $0xec] ss:$16 sps:$4 sm:$0xff]  }
  0x3f   :  { %v2257_v15 = vld [vmem:[#allocation2 + $0x3a4] ss:$16 sps:$4 sm:$0xff]   ;;  %v2255_v17 = vld [vmem:[#allocation2 + $0x3a0] ss:$16 sps:$4 sm:$0xff]  }
  0x40   :  { %294 = vmatmul.mubr.bf16.vlgmr.msra.gmra.mxu0 %v2191_v39  ;;  %337 = vmatmul.mubr.bf16.vlgmr.msra.gmra.mxu1 %v2191_v39  ;;  %v2260_v18 = vld [vmem:[#allocation2 + $0x184] ss:$16 sps:$4 sm:$0xff]   ;;  %v2258_v20 = vld [vmem:[#allocation2 + $0x180] ss:$16 sps:$4 sm:$0xff]   ;;  %v2293_v39 = vld [vmem:[#allocation2 + $0x2ec] ss:$16 sps:$4 sm:$0xff]  }
  0x41   :  { %1289 = vmatpush1.bf16.msra.mxu0 %v2192_v40  ;;  %1332 = vmatpush1.bf16.msra.mxu1 %v2195_v41  ;;  %v2263_v19 = vld [vmem:[#allocation2 + $0x384] ss:$16 sps:$4 sm:$0xff]   ;;  %v2261_v21 = vld [vmem:[#allocation2 + $0x380] ss:$16 sps:$4 sm:$0xff]   ;;  %v379_v40 = vlaneseq }
  0x42   :  { %1290 = vmatprep.subr.bf16.mxu0 %v2200_v42  ;;  %1333 = vmatprep.subr.bf16.mxu1 %v2203_v43  ;;  %v2266_v22 = vld [vmem:[#allocation2 + $0x164] ss:$16 sps:$4 sm:$0xff]   ;;  %v2264_v24 = vld [vmem:[#allocation2 + $0x160] ss:$16 sps:$4 sm:$0xff]  }
  0x43   :  { %v2269_v23 = vld [vmem:[#allocation2 + $0x364] ss:$16 sps:$4 sm:$0xff]   ;;  %v2267_v25 = vld [vmem:[#allocation2 + $0x360] ss:$16 sps:$4 sm:$0xff]   ;;  %v380_v41 = vshrl.u32 %v379_v40, 7 }
  0x44   :  { %v2272_v26 = vld [vmem:[#allocation2 + $0x144] ss:$16 sps:$4 sm:$0xff]   ;;  %v2270_v28 = vld [vmem:[#allocation2 + $0x140] ss:$16 sps:$4 sm:$0xff]  }
  0x45   :  { %1291 = vmatpush1.bf16.msra.mxu0 %v2198_v44  ;;  %1334 = vmatpush1.bf16.msra.mxu1 %v2201_v45  ;;  %v2275_v27 = vld [vmem:[#allocation2 + $0x344] ss:$16 sps:$4 sm:$0xff]   ;;  %v2273_v29 = vld [vmem:[#allocation2 + $0x340] ss:$16 sps:$4 sm:$0xff]   ;;  %v2713_v42 = vsub.s32 0, %v380_v41  ;;  %v2715_v43 = vsub.s32 2, %v380_v41 }
  0x46   :  { %1292 = vmatprep.subr.bf16.mxu0 %v2206_v46  ;;  %1335 = vmatprep.subr.bf16.mxu1 %v2209_v47  ;;  %v2278_v30 = vld [vmem:[#allocation2 + $0x124] ss:$16 sps:$4 sm:$0xff]   ;;  %v2276_v32 = vld [vmem:[#allocation2 + $0x120] ss:$16 sps:$4 sm:$0xff]   ;;  %v2720_v45 = vsub.s32 1, %v380_v41  ;;  %v2722_v46 = vsub.s32 3, %v380_v41 }
  0x47   :  { %v2281_v31 = vld [vmem:[#allocation2 + $0x324] ss:$16 sps:$4 sm:$0xff]   ;;  %v2279_v33 = vld [vmem:[#allocation2 + $0x320] ss:$16 sps:$4 sm:$0xff]  }
  0x48   :  { %v2282_v34 = vld [vmem:[#allocation2 + $0x100] ss:$16 sps:$4 sm:$0xff]   ;;  %v2284_v35 = vld [vmem:[#allocation2 + $0x104] ss:$16 sps:$4 sm:$0xff]  }
  0x49   :  { %1293 = vmatpush1.bf16.msra.mxu0 %v2204_v48  ;;  %1336 = vmatpush1.bf16.msra.mxu1 %v2207_v49  ;;  %v2285_v36 = vld [vmem:[#allocation2 + $0x300] ss:$16 sps:$4 sm:$0xff]   ;;  %v2287_v37 = vld [vmem:[#allocation2 + $0x304] ss:$16 sps:$4 sm:$0xff]  }
  0x4a   :  { %1294 = vmatprep.subr.bf16.mxu0 %v2212_v50  ;;  %1337 = vmatprep.subr.bf16.mxu1 %v2215_v51  ;;  %v367_v44 = vld [vmem:[%s2778_s3] sm:$0xf] }
  0x4b   :  { %v382_v48 = vrot.slane %v367_v44, %v2713_v42  ;;  %v390_v49 = vrot.slane %v367_v44, %v2715_v43  ;;  %v415_v50 = vld [vmem:[%s2779_s4] ss:$2 sm:$0xf]  ;;  %v386_v51 = vrot.slane %v367_v44, %v2720_v45 }
  0x4d   :  { %1295 = vmatpush1.bf16.msra.mxu0 %v2210_v52  ;;  %1338 = vmatpush1.bf16.msra.mxu1 %v2213_v53  ;;  %v394_v52 = vrot.slane %v367_v44, %v2722_v46 }
  0x4e   :  { %1296 = vmatprep.subr.bf16.mxu0 %v2218_v54  ;;  %1339 = vmatprep.subr.bf16.mxu1 %v2221_v57  ;;  %v420_v57 = vrot.slane %v415_v50, %v2713_v42 }
  0x51   :  { %1297 = vmatpush1.bf16.msra.mxu0 %v2216_v55  ;;  %1340 = vmatpush1.bf16.msra.mxu1 %v2219_v56 }
  0x52   :  { %1298 = vmatprep.subr.bf16.mxu0 %v2224_v58  ;;  %1341 = vmatprep.subr.bf16.mxu1 %v2227_v59  ;;  %v428_v59 = vrot.slane %v415_v50, %v2715_v43 }
  0x55   :  { %1299 = vmatpush1.bf16.msra.mxu0 %v2222_v60  ;;  %1342 = vmatpush1.bf16.msra.mxu1 %v2225_v61 }
  0x56   :  { %1300 = vmatprep.subr.bf16.mxu0 %v2230_v62  ;;  %1343 = vmatprep.subr.bf16.mxu1 %v2233_v63 }
  0x59   :  { %1301 = vmatpush1.bf16.msra.mxu0 %v2228_v0  ;;  %1344 = vmatpush1.bf16.msra.mxu1 %v2231_v1 }
  0x5a   :  { %1302 = vmatprep.subr.bf16.mxu0 %v2236_v2  ;;  %1345 = vmatprep.subr.bf16.mxu1 %v2239_v3  ;;  %v424_v2 = vrot.slane %v415_v50, %v2720_v45 }
  0x5d   :  { %1303 = vmatpush1.bf16.msra.mxu0 %v2234_v4  ;;  %1346 = vmatpush1.bf16.msra.mxu1 %v2237_v5  ;;  %v432_v4 = vrot.slane %v415_v50, %v2722_v46 }
  0x5e   :  { %1304 = vmatprep.subr.bf16.mxu0 %v2242_v6  ;;  %1347 = vmatprep.subr.bf16.mxu1 %v2245_v7 }
  0x61   :  { %1305 = vmatpush2.bf16.msra.mxu0 %v2240_v8  ;;  %1348 = vmatpush2.bf16.msra.mxu1 %v2243_v9 }
  0x62   :  { %1306 = vmatprep.subr.bf16.mxu0 %v2248_v10  ;;  %1349 = vmatprep.subr.bf16.mxu1 %v2251_v11 }
  0x65   :  { %1307 = vmatpush2.bf16.msra.mxu0 %v2246_v12  ;;  %1350 = vmatpush2.bf16.msra.mxu1 %v2249_v13 }
  0x66   :  { %1308 = vmatprep.subr.bf16.mxu0 %v2254_v14  ;;  %1351 = vmatprep.subr.bf16.mxu1 %v2257_v15 }
  0x69   :  { %1309 = vmatpush2.bf16.msra.mxu0 %v2252_v16  ;;  %1352 = vmatpush2.bf16.msra.mxu1 %v2255_v17 }
  0x6a   :  { %1310 = vmatprep.subr.bf16.mxu0 %v2260_v18  ;;  %1353 = vmatprep.subr.bf16.mxu1 %v2263_v19 }
  0x6d   :  { %1311 = vmatpush2.bf16.msra.mxu0 %v2258_v20  ;;  %1354 = vmatpush2.bf16.msra.mxu1 %v2261_v21 }
  0x6e   :  { %1312 = vmatprep.subr.bf16.mxu0 %v2266_v22  ;;  %1355 = vmatprep.subr.bf16.mxu1 %v2269_v23 }
  0x71   :  { %1313 = vmatpush2.bf16.msra.mxu0 %v2264_v24  ;;  %1356 = vmatpush2.bf16.msra.mxu1 %v2267_v25 }
  0x72   :  { %1314 = vmatprep.subr.bf16.mxu0 %v2272_v26  ;;  %1357 = vmatprep.subr.bf16.mxu1 %v2275_v27 }
  0x75   :  { %1315 = vmatpush2.bf16.msra.mxu0 %v2270_v28  ;;  %1358 = vmatpush2.bf16.msra.mxu1 %v2273_v29 }
  0x76   :  { %1316 = vmatprep.subr.bf16.mxu0 %v2278_v30  ;;  %1359 = vmatprep.subr.bf16.mxu1 %v2281_v31 }
  0x79   :  { %1317 = vmatpush2.bf16.msra.mxu0 %v2276_v32  ;;  %1360 = vmatpush2.bf16.msra.mxu1 %v2279_v33 }
  0x7a   :  { %1318 = vmatprep.subr.bf16.mxu0 %v2284_v35  ;;  %1361 = vmatprep.subr.bf16.mxu1 %v2287_v37 }
  0x7d   :  { %1319 = vmatpush2.bf16.msra.mxu0 %v2282_v34  ;;  %1362 = vmatpush2.bf16.msra.mxu1 %v2285_v36 }
  0x7e   :  { %1374 = vmatprep.subr.bf16.mxu0 %v2290_v38  ;;  %1417 = vmatprep.subr.bf16.mxu1 %v2293_v39 }
  0xa3   :  { %v350_v53 = vpop.permute.xlu0 %349 }
  0xa6   :  { %v371_v47 = vpop.permute.xlu1 %370 }
  0xa7   :  { %v399_v54 = vmul.f32 %v382_v48, %v371_v47  ;;  %v401_v55 = vmul.f32 %v390_v49, %v371_v47  ;;  %v400_v62 = vmul.f32 %v386_v51, %v371_v47  ;;  %v402_v63 = vmul.f32 %v394_v52, %v371_v47  ;;  %v355_v17 = vpop.permute.xlu0 %354 }
  0xaa   :  { %v376_v0 = vpop.permute.xlu1 %375 }
  0xab   :  { %v403_v9 = vmul.f32 %v382_v48, %v376_v0  ;;  %v404_v10 = vmul.f32 %v386_v51, %v376_v0  ;;  %v405_v18 = vmul.f32 %v390_v49, %v376_v0  ;;  %v406_v19 = vmul.f32 %v394_v52, %v376_v0 }
 0x100   :  { %v295_v56 = vpop.f32.mrf.mxu0  ;;  %v338_v58 = vpop.f32.mrf.mxu1 }
 0x101   :  { %v357_v60 = vmul.f32 %v350_v53, %v295_v56  ;;  %v359_v61 = vmul.f32 %v350_v53, %v338_v58 }
 0x102   :  { %v297_v1 = vpop.f32.mrf.mxu0  ;;  %v340_v3 = vpop.f32.mrf.mxu1 }
 0x103   :  { %v407_v5 = vadd.f32 %v399_v54, %v357_v60  ;;  %v409_v6 = vadd.f32 %v401_v55, %v359_v61  ;;  %v358_v7 = vmul.f32 %v350_v53, %v297_v1  ;;  %v360_v8 = vmul.f32 %v350_v53, %v340_v3 }
 0x104   :  { %v299_v11 = vpop.f32.mrf.mxu0  ;;  %v342_v12 = vpop.f32.mrf.mxu1 }
 0x105   :  { %v2735_v13 = vadd.f32 %v420_v57, %v407_v5  ;;  %v2737_v14 = vadd.f32 %v428_v59, %v409_v6  ;;  %v408_v15 = vadd.f32 %v400_v62, %v358_v7  ;;  %v410_v16 = vadd.f32 %v402_v63, %v360_v8 }
 0x106   :  { %v361_v20 = vmul.f32 %v355_v17, %v299_v11  ;;  %v363_v21 = vmul.f32 %v355_v17, %v342_v12  ;;  %v301_v22 = vpop.f32.mrf.mxu0  ;;  %v344_v23 = vpop.f32.mrf.mxu1 }
 0x107   :  { %v445_v24 = vsub.f32 0.0, %v2735_v13  ;;  %v447_v25 = vsub.f32 0.0, %v2737_v14  ;;  %v2741_v26 = vadd.f32 %v424_v2, %v408_v15  ;;  %v2743_v27 = vadd.f32 %v432_v4, %v410_v16 }
 0x108   :  { %v411_v28 = vadd.f32 %v403_v9, %v361_v20  ;;  %v413_v29 = vadd.f32 %v405_v18, %v363_v21  ;;  %v362_v30 = vmul.f32 %v355_v17, %v301_v22  ;;  %v364_v31 = vmul.f32 %v355_v17, %v344_v23 }
 0x109   :  { %v453_v32 = vmul.f32 1.442695, %v445_v24  ;;  %v457_v33 = vmul.f32 1.442695, %v447_v25  ;;  %v446_v34 = vsub.f32 0.0, %v2741_v26  ;;  %v448_v35 = vsub.f32 0.0, %v2743_v27 }
 0x10a   :  { %v441_v36 = vadd.f32 %v420_v57, %v411_v28  ;;  %v443_v37 = vadd.f32 %v428_v59, %v413_v29  ;;  %v412_v38 = vadd.f32 %v404_v10, %v362_v30  ;;  %v414_v39 = vadd.f32 %v406_v19, %v364_v31  ;;  %v2288_v29 = vld [vmem:[#allocation2 + $0xe8] ss:$16 sps:$4 sm:$0xff]  }
 0x10b   :  { %2416 = vpow2.f32 %v453_v32  ;;  %v455_v40 = vmul.f32 1.442695, %v446_v34  ;;  %v459_v41 = vmul.f32 1.442695, %v448_v35  ;;  %v2291_v31 = vld [vmem:[#allocation2 + $0x2e8] ss:$16 sps:$4 sm:$0xff]  }
 0x10c   :  { %2418 = vpow2.f32 %v457_v33  ;;  %v449_v44 = vsub.f32 0.0, %v441_v36  ;;  %v451_v47 = vsub.f32 0.0, %v443_v37  ;;  %v442_v48 = vadd.f32 %v424_v2, %v412_v38  ;;  %v2296_v34 = vld [vmem:[#allocation2 + $0xcc] ss:$16 sps:$4 sm:$0xff]  }
 0x10d   :  { %2420 = vpow2.f32 %v455_v40  ;;  %v444_v49 = vadd.f32 %v432_v4, %v414_v39  ;;  %v2305_v35 = vld [vmem:[#allocation2 + $0x2ac] ss:$16 sps:$4 sm:$0xff]   ;;  %v2306_v40 = vld [vmem:[#allocation2 + $0x88] ss:$16 sps:$4 sm:$0xff]  }
 0x10e   :  { %2422 = vpow2.f32 %v459_v41  ;;  %v461_v50 = vmul.f32 1.442695, %v449_v44  ;;  %v465_v51 = vmul.f32 1.442695, %v451_v47  ;;  %v450_v52 = vsub.f32 0.0, %v442_v48 }
 0x10f   :  { %v452_v53 = vsub.f32 0.0, %v444_v49  ;;  %v2308_v38 = vld [vmem:[#allocation2 + $0x8c] ss:$16 sps:$4 sm:$0xff]   ;;  %v2309_v41 = vld [vmem:[#allocation2 + $0x288] ss:$16 sps:$4 sm:$0xff]  }
 0x110   :  { %2424 = vpow2.f32 %v461_v50  ;;  %v463_v54 = vmul.f32 1.442695, %v450_v52  ;;  %v2311_v39 = vld [vmem:[#allocation2 + $0x28c] ss:$16 sps:$4 sm:$0xff]   ;;  %v2318_v52 = vld [vmem:[#allocation2 + $0x48] ss:$16 sps:$4 sm:$0xff]  }
 0x111   :  { %2426 = vpow2.f32 %v465_v51  ;;  %v467_v55 = vmul.f32 1.442695, %v452_v53  ;;  %v2314_v44 = vld [vmem:[#allocation2 + $0x6c] ss:$16 sps:$4 sm:$0xff]   ;;  %v2321_v53 = vld [vmem:[#allocation2 + $0x248] ss:$16 sps:$4 sm:$0xff]  }
 0x112   :  { %2428 = vpow2.f32 %v463_v54  ;;  %v2317_v47 = vld [vmem:[#allocation2 + $0x26c] ss:$16 sps:$4 sm:$0xff]  }
 0x113   :  { %2430 = vpow2.f32 %v467_v55  ;;  %v2320_v50 = vld [vmem:[#allocation2 + $0x4c] ss:$16 sps:$4 sm:$0xff]  }
 0x114   :  { %v2323_v51 = vld [vmem:[#allocation2 + $0x24c] ss:$16 sps:$4 sm:$0xff]  }
 0x115   :  { %v2326_v54 = vld [vmem:[#allocation2 + $0x2c] ss:$16 sps:$4 sm:$0xff]  }
 0x116   :  { %v2329_v55 = vld [vmem:[#allocation2 + $0x22c] ss:$16 sps:$4 sm:$0xff]  }
 0x118   :  { %v2417_v56 = vpop.eup %2416 }
 0x119   :  { %v2419_v57 = vpop.eup %2418  ;;  %v469_v58 = vadd.f32 1.0, %v2417_v56  ;;  %v2324_v56 = vld [vmem:[#allocation2 + $0x28] ss:$16 sps:$4 sm:$0xff]  }
 0x11a   :  { %v2421_v59 = vpop.eup %2420  ;;  %v471_v60 = vadd.f32 1.0, %v2419_v57  ;;  %v2327_v57 = vld [vmem:[#allocation2 + $0x228] ss:$16 sps:$4 sm:$0xff]  }
 0x11b   :  { %v2423_v61 = vpop.eup %2422  ;;  %v470_v62 = vadd.f32 1.0, %v2421_v59  ;;  %2432 = vrcp.f32 %v469_v58  ;;  %v2332_v58 = vld [vmem:[#allocation2 + $0xc] ss:$16 sps:$4 sm:$0xff]  }
 0x11c   :  { %v472_v63 = vadd.f32 1.0, %v2423_v61  ;;  %2434 = vrcp.f32 %v471_v60  ;;  %v2335_v59 = vld [vmem:[#allocation2 + $0x20c] ss:$16 sps:$4 sm:$0xff]   ;;  %v2330_v60 = vld [vmem:[#allocation2 + $0x8] ss:$16 sps:$4 sm:$0xff]  }
 0x11d   :  { %v2425_v0 = vpop.eup %2424  ;;  %2436 = vrcp.f32 %v470_v62  ;;  %v2333_v61 = vld [vmem:[#allocation2 + $0x208] ss:$16 sps:$4 sm:$0xff]   ;;  %v2338_v62 = vld [vmem:[#allocation2 + $0x1ec] ss:$16 sps:$4 sm:$0xff]  }
 0x11e   :  { %v2427_v1 = vpop.eup %2426  ;;  %v473_v2 = vadd.f32 1.0, %v2425_v0  ;;  %2438 = vrcp.f32 %v472_v63  ;;  %v2341_v63 = vld [vmem:[#allocation2 + $0x3ec] ss:$16 sps:$4 sm:$0xff]   ;;  %v2336_v0 = vld [vmem:[#allocation2 + $0x1e8] ss:$16 sps:$4 sm:$0xff]  }
 0x11f   :  { %v2429_v3 = vpop.eup %2428  ;;  %v475_v4 = vadd.f32 1.0, %v2427_v1  ;;  %v2339_v1 = vld [vmem:[#allocation2 + $0x3e8] ss:$16 sps:$4 sm:$0xff]  }
 0x120   :  { %v2431_v5 = vpop.eup %2430  ;;  %2440 = vrcp.f32 %v473_v2  ;;  %v474_v6 = vadd.f32 1.0, %v2429_v3  ;;  %v2344_v2 = vld [vmem:[#allocation2 + $0x1cc] ss:$16 sps:$4 sm:$0xff]  }
 0x121   :  { %2442 = vrcp.f32 %v475_v4  ;;  %v476_v7 = vadd.f32 1.0, %v2431_v5  ;;  %v2347_v3 = vld [vmem:[#allocation2 + $0x3cc] ss:$16 sps:$4 sm:$0xff]   ;;  %v2342_v4 = vld [vmem:[#allocation2 + $0x1c8] ss:$16 sps:$4 sm:$0xff]  }
 0x122   :  { %2444 = vrcp.f32 %v474_v6  ;;  %v2345_v5 = vld [vmem:[#allocation2 + $0x3c8] ss:$16 sps:$4 sm:$0xff]   ;;  %v2350_v6 = vld [vmem:[#allocation2 + $0x1ac] ss:$16 sps:$4 sm:$0xff]  }
 0x123   :  { %2446 = vrcp.f32 %v476_v7  ;;  %v2353_v7 = vld [vmem:[#allocation2 + $0x3ac] ss:$16 sps:$4 sm:$0xff]  }
 0x128   :  { %v2433_v8 = vpop.eup %2432 }
 0x129   :  { %v2435_v9 = vpop.eup %2434  ;;  %v485_v22 = vmul.f32 %v2433_v8, %v2735_v13  ;;  %v2294_v13 = vld [vmem:[#allocation2 + $0xc8] ss:$16 sps:$4 sm:$0xff]  }
 0x12a   :  { %v2437_v10 = vpop.eup %2436  ;;  %v487_v25 = vmul.f32 %v2435_v9, %v2737_v14  ;;  %v2297_v14 = vld [vmem:[#allocation2 + $0x2c8] ss:$16 sps:$4 sm:$0xff]  }
 0x12b   :  { %v2439_v11 = vpop.eup %2438  ;;  %v486_v20 = vmul.f32 %v2437_v10, %v2741_v26  ;;  %v2299_v26 = vld [vmem:[#allocation2 + $0x2cc] ss:$16 sps:$4 sm:$0xff]   ;;  %v2348_v8 = vld [vmem:[#allocation2 + $0x1a8] ss:$16 sps:$4 sm:$0xff]  }
 0x12c   :  { %v488_v23 = vmul.f32 %v2439_v11, %v2743_v27  ;;  %v2302_v27 = vld [vmem:[#allocation2 + $0xac] ss:$16 sps:$4 sm:$0xff]   ;;  %v2351_v9 = vld [vmem:[#allocation2 + $0x3a8] ss:$16 sps:$4 sm:$0xff]  }
 0x12d   :  { %v2441_v12 = vpop.eup %2440  ;;  %v2356_v10 = vld [vmem:[#allocation2 + $0x18c] ss:$16 sps:$4 sm:$0xff]  }
 0x12e   :  { %v2443_v15 = vpop.eup %2442  ;;  %v489_v17 = vmul.f32 %v2441_v12, %v441_v36  ;;  %v2300_v36 = vld [vmem:[#allocation2 + $0xa8] ss:$16 sps:$4 sm:$0xff]   ;;  %v2359_v11 = vld [vmem:[#allocation2 + $0x38c] ss:$16 sps:$4 sm:$0xff]  }
 0x12f   :  { %v2445_v16 = vpop.eup %2444  ;;  %v491_v19 = vmul.f32 %v2443_v15, %v443_v37  ;;  %v2303_v37 = vld [vmem:[#allocation2 + $0x2a8] ss:$16 sps:$4 sm:$0xff]  }
 0x130   :  { %v2447_v18 = vpop.eup %2446  ;;  %v490_v21 = vmul.f32 %v2445_v16, %v442_v48  ;;  %v2751_v32 = vpack.c.bf16 %v489_v17, %v485_v22  ;;  %v2312_v48 = vld [vmem:[#allocation2 + $0x68] ss:$16 sps:$4 sm:$0xff]   ;;  %v2362_v16 = vld [vmem:[#allocation2 + $0x16c] ss:$16 sps:$4 sm:$0xff]  }
 0x131   :  { %v492_v24 = vmul.f32 %v2447_v18, %v444_v49  ;;  %v2753_v33 = vpack.c.bf16 %v491_v19, %v487_v25  ;;  %v2315_v49 = vld [vmem:[#allocation2 + $0x268] ss:$16 sps:$4 sm:$0xff]   ;;  %v2365_v17 = vld [vmem:[#allocation2 + $0x36c] ss:$16 sps:$4 sm:$0xff]  }
 0x132   :  { %v494_v28 = vpack.c.bf16 %v490_v21, %v486_v20  ;;  %v2354_v12 = vld [vmem:[#allocation2 + $0x188] ss:$16 sps:$4 sm:$0xff]   ;;  %v2368_v20 = vld [vmem:[#allocation2 + $0x14c] ss:$16 sps:$4 sm:$0xff]  }
 0x133   :  { %v496_v30 = vpack.c.bf16 %v492_v24, %v488_v23  ;;  %v2357_v15 = vld [vmem:[#allocation2 + $0x388] ss:$16 sps:$4 sm:$0xff]   ;;  %v2371_v21 = vld [vmem:[#allocation2 + $0x34c] ss:$16 sps:$4 sm:$0xff]  }
 0x134   :  { %1320 = vmatprep.mubr.bf16.mxu0 %v494_v28  ;;  %v2360_v18 = vld [vmem:[#allocation2 + $0x168] ss:$16 sps:$4 sm:$0xff]   ;;  %v2374_v24 = vld [vmem:[#allocation2 + $0x12c] ss:$16 sps:$4 sm:$0xff]  }
 0x135   :  { %1363 = vmatprep.mubr.bf16.mxu1 %v496_v30  ;;  %1321 = vmatmul.mubr.bf16.vlgmr.msra.gmra.mxu0 %v2751_v32  ;;  %v2363_v19 = vld [vmem:[#allocation2 + $0x368] ss:$16 sps:$4 sm:$0xff]   ;;  %v2377_v25 = vld [vmem:[#allocation2 + $0x32c] ss:$16 sps:$4 sm:$0xff]  }
 0x136   :  { %1364 = vmatmul.mubr.bf16.vlgmr.msra.gmra.mxu1 %v2753_v33  ;;  %1375 = vmatpush1.bf16.msra.mxu0 %v2288_v29  ;;  %v2366_v22 = vld [vmem:[#allocation2 + $0x148] ss:$16 sps:$4 sm:$0xff]  }
 0x137   :  { %1418 = vmatpush1.bf16.msra.mxu1 %v2291_v31  ;;  %1406 = vmatprep.mubr.bf16.mxu0 %v494_v28  ;;  %v2369_v23 = vld [vmem:[#allocation2 + $0x348] ss:$16 sps:$4 sm:$0xff]   ;;  %v2383_v31 = vld [vmem:[#allocation2 + $0x30c] ss:$16 sps:$4 sm:$0xff]  }
 0x138   :  { %1449 = vmatprep.mubr.bf16.mxu1 %v496_v30  ;;  %1376 = vmatprep.subr.bf16.mxu0 %v2296_v34  ;;  %v2372_v28 = vld [vmem:[#allocation2 + $0x128] ss:$16 sps:$4 sm:$0xff]   ;;  %v2380_v30 = vld [vmem:[#allocation2 + $0x10c] ss:$16 sps:$4 sm:$0xff]  }
 0x139   :  { %1419 = vmatprep.subr.bf16.mxu1 %v2299_v26  ;;  %v2375_v29 = vld [vmem:[#allocation2 + $0x328] ss:$16 sps:$4 sm:$0xff]  }
 0x13a   :  { %1377 = vmatpush1.bf16.msra.mxu0 %v2294_v13  ;;  %v2378_v34 = vld [vmem:[#allocation2 + $0x108] ss:$16 sps:$4 sm:$0xff]  }
 0x13b   :  { %1420 = vmatpush1.bf16.msra.mxu1 %v2297_v14  ;;  %1378 = vmatprep.subr.bf16.mxu0 %v2302_v27  ;;  %v2381_v26 = vld [vmem:[#allocation2 + $0x308] ss:$16 sps:$4 sm:$0xff]   ;;  %v2386_v27 = vld [vmem:[#allocation5 + $0x70] sm:$0xff]  }
 0x13c   :  { %1421 = vmatprep.subr.bf16.mxu1 %v2305_v35  ;;  %v2384_v13 = vld [vmem:[#allocation5 + $0x78] sm:$0xff]   ;;  %v2387_v35 = vld [vmem:[#allocation5 + $0x30] sm:$0xff]  }
 0x13d   :  { %v2385_v14 = vld [vmem:[#allocation5 + $0x38] sm:$0xff]  }
 0x13e   :  { %1379 = vmatpush1.bf16.msra.mxu0 %v2300_v36  ;;  %v2388_v36 = vld [vmem:[#allocation5 + $0x68] sm:$0xff]  }
 0x13f   :  { %1422 = vmatpush1.bf16.msra.mxu1 %v2303_v37  ;;  %1380 = vmatprep.subr.bf16.mxu0 %v2308_v38  ;;  %v2389_v37 = vld [vmem:[#allocation5 + $0x28] sm:$0xff]   ;;  %v2390_v38 = vld [vmem:[#allocation5 + $0x60] sm:$0xff]  }
 0x140   :  { %1423 = vmatprep.subr.bf16.mxu1 %v2311_v39  ;;  %v2391_v39 = vld [vmem:[#allocation5 + $0x20] sm:$0xff]  }
 0x142   :  { %1381 = vmatpush1.bf16.msra.mxu0 %v2306_v40  ;;  %v2392_v40 = vld [vmem:[#allocation5 + $0x58] sm:$0xff]  }
 0x143   :  { %1424 = vmatpush1.bf16.msra.mxu1 %v2309_v41  ;;  %1382 = vmatprep.subr.bf16.mxu0 %v2314_v44  ;;  %v2395_v41 = vld [vmem:[#allocation5 + $0x10] sm:$0xff]   ;;  %v2396_v44 = vld [vmem:[#allocation5 + $0x48] sm:$0xff]  }
 0x144   :  { %1425 = vmatprep.subr.bf16.mxu1 %v2317_v47  ;;  %v2397_v47 = vld [vmem:[#allocation5 + $0x8] sm:$0xff]  }
 0x146   :  { %1383 = vmatpush1.bf16.msra.mxu0 %v2312_v48  ;;  %v2398_v48 = vld [vmem:[#allocation5 + $0x40] sm:$0xff]  }
 0x147   :  { %1426 = vmatpush1.bf16.msra.mxu1 %v2315_v49  ;;  %1384 = vmatprep.subr.bf16.mxu0 %v2320_v50  ;;  %v2399_v49 = vld [vmem:[#allocation5] sm:$0xff]   ;;  %v2400_v50 = vld [vmem:[#allocation5 + $0xf8] sm:$0xff]  }
 0x148   :  { %1427 = vmatprep.subr.bf16.mxu1 %v2323_v51  ;;  %v2401_v51 = vld [vmem:[#allocation5 + $0xb8] sm:$0xff]  }
 0x14a   :  { %1385 = vmatpush1.bf16.msra.mxu0 %v2318_v52  ;;  %v2402_v52 = vld [vmem:[#allocation5 + $0xf0] sm:$0xff]  }
 0x14b   :  { %1428 = vmatpush1.bf16.msra.mxu1 %v2321_v53  ;;  %1386 = vmatprep.subr.bf16.mxu0 %v2326_v54  ;;  %v2403_v53 = vld [vmem:[#allocation5 + $0xb0] sm:$0xff]   ;;  %v2404_v54 = vld [vmem:[#allocation5 + $0xe8] sm:$0xff]  }
 0x14c   :  { %1429 = vmatprep.subr.bf16.mxu1 %v2329_v55  ;;  %v2405_v55 = vld [vmem:[#allocation5 + $0xa8] sm:$0xff]  }
 0x14e   :  { %1387 = vmatpush1.bf16.msra.mxu0 %v2324_v56  ;;  %v2406_v56 = vld [vmem:[#allocation5 + $0xe0] sm:$0xff]  }
 0x14f   :  { %1430 = vmatpush1.bf16.msra.mxu1 %v2327_v57  ;;  %1388 = vmatprep.subr.bf16.mxu0 %v2332_v58  ;;  %v2407_v57 = vld [vmem:[#allocation5 + $0xa0] sm:$0xff]   ;;  %v2408_v58 = vld [vmem:[#allocation5 + $0xd8] sm:$0xff]  }
 0x150   :  { %1431 = vmatprep.subr.bf16.mxu1 %v2335_v59  ;;  %v2409_v59 = vld [vmem:[#allocation5 + $0x98] sm:$0xff]  }
 0x152   :  { %1389 = vmatpush1.bf16.msra.mxu0 %v2330_v60  ;;  %v2410_v60 = vld [vmem:[#allocation5 + $0xd0] sm:$0xff]  }
 0x153   :  { %1432 = vmatpush1.bf16.msra.mxu1 %v2333_v61  ;;  %1390 = vmatprep.subr.bf16.mxu0 %v2338_v62  ;;  %v2411_v61 = vld [vmem:[#allocation5 + $0x90] sm:$0xff]   ;;  %v2412_v62 = vld [vmem:[#allocation5 + $0xc8] sm:$0xff]  }
 0x154   :  { %1433 = vmatprep.subr.bf16.mxu1 %v2341_v63  ;;  %v2413_v63 = vld [vmem:[#allocation5 + $0x88] sm:$0xff]  }
 0x156   :  { %1391 = vmatpush2.bf16.msra.mxu0 %v2336_v0  ;;  %v2414_v0 = vld [vmem:[#allocation5 + $0xc0] sm:$0xff]  }
 0x157   :  { %1434 = vmatpush2.bf16.msra.mxu1 %v2339_v1  ;;  %1392 = vmatprep.subr.bf16.mxu0 %v2344_v2  ;;  %v2415_v1 = vld [vmem:[#allocation5 + $0x80] sm:$0xff]  }
 0x158   :  { %1435 = vmatprep.subr.bf16.mxu1 %v2347_v3  ;;  %v1918_v2 = vld [vmem:[%s2779_s4 + $0x1] ss:$2 sm:$0xf] }
 0x159   :  { %v631_v3 = vrot.slane %v1918_v2, %v2713_v42 }
 0x15a   :  { %1393 = vmatpush2.bf16.msra.mxu0 %v2342_v4  ;;  %v635_v4 = vrot.slane %v1918_v2, %v2720_v45 }
 0x15b   :  { %1436 = vmatpush2.bf16.msra.mxu1 %v2345_v5  ;;  %1394 = vmatprep.subr.bf16.mxu0 %v2350_v6 }
 0x15c   :  { %1437 = vmatprep.subr.bf16.mxu1 %v2353_v7 }
 0x15e   :  { %1395 = vmatpush2.bf16.msra.mxu0 %v2348_v8 }
 0x15f   :  { %1438 = vmatpush2.bf16.msra.mxu1 %v2351_v9  ;;  %1396 = vmatprep.subr.bf16.mxu0 %v2356_v10 }
 0x160   :  { %1439 = vmatprep.subr.bf16.mxu1 %v2359_v11 }
 0x162   :  { %1397 = vmatpush2.bf16.msra.mxu0 %v2354_v12 }
 0x163   :  { %1440 = vmatpush2.bf16.msra.mxu1 %v2357_v15  ;;  %1398 = vmatprep.subr.bf16.mxu0 %v2362_v16 }
 0x164   :  { %1441 = vmatprep.subr.bf16.mxu1 %v2365_v17 }
 0x166   :  { %1399 = vmatpush2.bf16.msra.mxu0 %v2360_v18 }
 0x167   :  { %1442 = vmatpush2.bf16.msra.mxu1 %v2363_v19  ;;  %1400 = vmatprep.subr.bf16.mxu0 %v2368_v20 }
 0x168   :  { %1443 = vmatprep.subr.bf16.mxu1 %v2371_v21 }
 0x16a   :  { %1401 = vmatpush2.bf16.msra.mxu0 %v2366_v22 }
 0x16b   :  { %1444 = vmatpush2.bf16.msra.mxu1 %v2369_v23  ;;  %1402 = vmatprep.subr.bf16.mxu0 %v2374_v24 }
 0x16c   :  { %1445 = vmatprep.subr.bf16.mxu1 %v2377_v25 }
 0x16e   :  { %1403 = vmatpush2.bf16.msra.mxu0 %v2372_v28 }
 0x16f   :  { %1446 = vmatpush2.bf16.msra.mxu1 %v2375_v29  ;;  %1404 = vmatprep.subr.bf16.mxu0 %v2380_v30 }
 0x170   :  { %1447 = vmatprep.subr.bf16.mxu1 %v2383_v31 }
 0x172   :  { %1405 = vmatpush2.bf16.msra.mxu0 %v2378_v34 }
 0x173   :  { %1448 = vmatpush2.bf16.msra.mxu1 %v2381_v26  ;;  %2089 = vmatprep.subr.bf16.mxu0 %v2384_v13 }
 0x174   :  { %2111 = vmatprep.subr.bf16.mxu1 %v2400_v50  ;;  %v643_v50 = vrot.slane %v1918_v2, %v2722_v46 }
 0x175   :  { %1407 = vmatmul.mubr.bf16.vlgmr.msra.gmra.mxu0 %v2751_v32  ;;  %v2393_v32 = vld [vmem:[#allocation5 + $0x18] sm:$0xff]  }
 0x176   :  { %1450 = vmatmul.mubr.bf16.vlgmr.msra.gmra.mxu1 %v2753_v33  ;;  %2090 = vmatpush3.bf16.msra.mxu0 %v2385_v14  ;;  %v2394_v33 = vld [vmem:[#allocation5 + $0x50] sm:$0xff]  }
 0x177   :  { %2091 = vmatprep.subr.bf16.mxu0 %v2386_v27  ;;  %2112 = vmatpush3.bf16.msra.mxu1 %v2401_v51 }
 0x178   :  { %2113 = vmatprep.subr.bf16.mxu1 %v2402_v52 }
 0x17a   :  { %2092 = vmatpush3.bf16.msra.mxu0 %v2387_v35 }
 0x17b   :  { %2093 = vmatprep.subr.bf16.mxu0 %v2388_v36  ;;  %2114 = vmatpush3.bf16.msra.mxu1 %v2403_v53 }
 0x17c   :  { %2115 = vmatprep.subr.bf16.mxu1 %v2404_v54 }
 0x17e   :  { %2094 = vmatpush3.bf16.msra.mxu0 %v2389_v37 }
 0x17f   :  { %2095 = vmatprep.subr.bf16.mxu0 %v2390_v38  ;;  %2116 = vmatpush3.bf16.msra.mxu1 %v2405_v55 }
 0x180   :  { %2117 = vmatprep.subr.bf16.mxu1 %v2406_v56 }
 0x182   :  { %2096 = vmatpush3.bf16.msra.mxu0 %v2391_v39 }
 0x183   :  { %2097 = vmatprep.subr.bf16.mxu0 %v2392_v40  ;;  %2118 = vmatpush3.bf16.msra.mxu1 %v2407_v57 }
 0x184   :  { %2119 = vmatprep.subr.bf16.mxu1 %v2408_v58 }
 0x186   :  { %2098 = vmatpush3.bf16.msra.mxu0 %v2393_v32 }
 0x187   :  { %2099 = vmatprep.subr.bf16.mxu0 %v2394_v33  ;;  %2120 = vmatpush3.bf16.msra.mxu1 %v2409_v59 }
 0x188   :  { %2121 = vmatprep.subr.bf16.mxu1 %v2410_v60 }
 0x18a   :  { %2100 = vmatpush3.bf16.msra.mxu0 %v2395_v41 }
 0x18b   :  { %2101 = vmatprep.subr.bf16.mxu0 %v2396_v44  ;;  %2122 = vmatpush3.bf16.msra.mxu1 %v2411_v61 }
 0x18c   :  { %2123 = vmatprep.subr.bf16.mxu1 %v2412_v62 }
 0x18e   :  { %2102 = vmatpush3.bf16.msra.mxu0 %v2397_v47 }
 0x18f   :  { %2103 = vmatprep.subr.bf16.mxu0 %v2398_v48  ;;  %2124 = vmatpush3.bf16.msra.mxu1 %v2413_v63 }
 0x190   :  { %2125 = vmatprep.subr.bf16.mxu1 %v2414_v0 }
 0x192   :  { %2104 = vmatpush3.bf16.msra.mxu0 %v2399_v49  ;;  %v639_v49 = vrot.slane %v1918_v2, %v2715_v43 }
 0x193   :  { %2126 = vmatpush3.bf16.msra.mxu1 %v2415_v1 }
 0x1f5   :  { %v1322_v5 = vpop.f32.mrf.mxu0 }
 0x1f6   :  { %v1323_v6 = vadd.f32 %v1322_v5, %v631_v3  ;;  %v1365_v7 = vpop.f32.mrf.mxu1 }
 0x1f7   :  { %v1324_v8 = vpop.f32.mrf.mxu0 }
 0x1f8   :  { %v1366_v9 = vadd.f32 %v1365_v7, %v1323_v6  ;;  %v1325_v10 = vadd.f32 %v1324_v8, %v635_v4  ;;  %v1367_v11 = vpop.f32.mrf.mxu1 }
 0x1f9   :  { %v1326_v12 = vpop.f32.mrf.mxu0 }
 0x1fa   :  { %v1460_v15 = vsub.f32 0.0, %v1366_v9  ;;  %v1368_v16 = vadd.f32 %v1367_v11, %v1325_v10  ;;  %v1327_v17 = vadd.f32 %v1326_v12, %v631_v3  ;;  %v1369_v18 = vpop.f32.mrf.mxu1 }
 0x1fb   :  { %v1328_v19 = vpop.f32.mrf.mxu0 }
 0x1fc   :  { %v1468_v20 = vmul.f32 1.442695, %v1460_v15  ;;  %v1461_v21 = vsub.f32 0.0, %v1368_v16  ;;  %v1370_v22 = vadd.f32 %v1369_v18, %v1327_v17  ;;  %v1329_v23 = vadd.f32 %v1328_v19, %v635_v4  ;;  %v1371_v42 = vpop.f32.mrf.mxu1 }
 0x1fe   :  { %v1470_v24 = vmul.f32 1.442695, %v1461_v21  ;;  %v1464_v45 = vsub.f32 0.0, %v1370_v22  ;;  %v1372_v25 = vadd.f32 %v1371_v42, %v1329_v23  ;;  %2448 = vpow2.f32 %v1468_v20 }
 0x200   :  { %2450 = vpow2.f32 %v1470_v24  ;;  %v1476_v28 = vmul.f32 1.442695, %v1464_v45  ;;  %v1465_v29 = vsub.f32 0.0, %v1372_v25 }
 0x202   :  { %2452 = vpow2.f32 %v1476_v28  ;;  %v1478_v30 = vmul.f32 1.442695, %v1465_v29 }
 0x204   :  { %2454 = vpow2.f32 %v1478_v30 }
 0x20b   :  { %v2449_v31 = vpop.eup %2448 }
 0x20c   :  { %v1484_v14 = vadd.f32 1.0, %v2449_v31 }
 0x20d   :  { %v2451_v34 = vpop.eup %2450 }
 0x20e   :  { %v1485_v26 = vadd.f32 1.0, %v2451_v34 }
 0x20f   :  { %v2453_v13 = vpop.eup %2452 }
 0x210   :  { %v1488_v27 = vadd.f32 1.0, %v2453_v13  ;;  %2456 = vrcp.f32 %v1485_v26 }
 0x211   :  { %v2455_v35 = vpop.eup %2454 }
 0x212   :  { %2458 = vrcp.f32 %v1488_v27  ;;  %v1489_v36 = vadd.f32 1.0, %v2455_v35  ;;  %v2047_v35 = vld [vmem:[%s2782_s7] ss:$0 sm:$0xff] }
 0x213   :  { %2460 = vrcp.f32 %v1484_v14 }
 0x214   :  { %2462 = vrcp.f32 %v1489_v36 }
 0x21d   :  { %v2457_v37 = vpop.eup %2456 }
 0x21e   :  { %v1501_v33 = vmul.f32 %v2457_v37, %v1368_v16 }
 0x21f   :  { %v2459_v38 = vpop.eup %2458 }
 0x220   :  { %v2461_v39 = vpop.eup %2460  ;;  %v1504_v32 = vmul.f32 %v2459_v38, %v1370_v22 }
 0x221   :  { %v2463_v40 = vpop.eup %2462  ;;  %v1500_v44 = vmul.f32 %v2461_v39, %v1366_v9 }
 0x222   :  { %v1505_v41 = vmul.f32 %v2463_v40, %v1372_v25 }
 0x223   :  { %v1508_v48 = vpack.c.bf16 %v1504_v32, %v1500_v44 }
 0x224   :  { %v1509_v47 = vpack.c.bf16 %v1505_v41, %v1501_v33 }
 0x226   :  { %1807 = vmatprep.mubr.bf16.mxu0 %v1509_v47 }
 0x227   :  { %1808 = vmatmul.mubr.bf16.vlgmr.msra.gmra.mxu0 %v1508_v48 }
 0x235   :  { %v1408_v51 = vpop.f32.mrf.mxu0 }
 0x236   :  { %v1409_v52 = vadd.f32 %v1408_v51, %v639_v49  ;;  %v1451_v53 = vpop.f32.mrf.mxu1 }
 0x237   :  { %v1410_v54 = vpop.f32.mrf.mxu0 }
 0x238   :  { %v1452_v55 = vadd.f32 %v1451_v53, %v1409_v52  ;;  %v1411_v56 = vadd.f32 %v1410_v54, %v643_v50  ;;  %v1453_v57 = vpop.f32.mrf.mxu1 }
 0x239   :  { %v1412_v58 = vpop.f32.mrf.mxu0 }
 0x23a   :  { %v1462_v59 = vsub.f32 0.0, %v1452_v55  ;;  %v1454_v60 = vadd.f32 %v1453_v57, %v1411_v56  ;;  %v1413_v61 = vadd.f32 %v1412_v58, %v639_v49  ;;  %v1455_v62 = vpop.f32.mrf.mxu1 }
 0x23b   :  { %v1414_v63 = vpop.f32.mrf.mxu0 }
 0x23c   :  { %v1472_v0 = vmul.f32 1.442695, %v1462_v59  ;;  %v1463_v1 = vsub.f32 0.0, %v1454_v60  ;;  %v1456_v3 = vadd.f32 %v1455_v62, %v1413_v61  ;;  %v1415_v4 = vadd.f32 %v1414_v63, %v643_v50  ;;  %v1457_v43 = vpop.f32.mrf.mxu1 }
 0x23e   :  { %v1474_v5 = vmul.f32 1.442695, %v1463_v1  ;;  %v1466_v46 = vsub.f32 0.0, %v1456_v3  ;;  %v1458_v2 = vadd.f32 %v1457_v43, %v1415_v4  ;;  %2464 = vpow2.f32 %v1472_v0 }
 0x240   :  { %2466 = vpow2.f32 %v1474_v5  ;;  %v1480_v6 = vmul.f32 1.442695, %v1466_v46  ;;  %v1467_v7 = vsub.f32 0.0, %v1458_v2 }
 0x242   :  { %2468 = vpow2.f32 %v1480_v6  ;;  %v1482_v8 = vmul.f32 1.442695, %v1467_v7 }
 0x244   :  { %2470 = vpow2.f32 %v1482_v8 }
 0x24b   :  { %v2465_v9 = vpop.eup %2464 }
 0x24c   :  { %v1486_v15 = vadd.f32 1.0, %v2465_v9 }
 0x24d   :  { %v2467_v10 = vpop.eup %2466 }
 0x24e   :  { %v1487_v11 = vadd.f32 1.0, %v2467_v10 }
 0x24f   :  { %v2469_v12 = vpop.eup %2468 }
 0x250   :  { %v1490_v16 = vadd.f32 1.0, %v2469_v12  ;;  %2472 = vrcp.f32 %v1487_v11 }
 0x251   :  { %v2471_v17 = vpop.eup %2470 }
 0x252   :  { %2474 = vrcp.f32 %v1490_v16  ;;  %v1491_v18 = vadd.f32 1.0, %v2471_v17 }
 0x253   :  { %2476 = vrcp.f32 %v1486_v15 }
 0x254   :  { %2478 = vrcp.f32 %v1491_v18 }
 0x25d   :  { %v2473_v19 = vpop.eup %2472 }
 0x25e   :  { %v1503_v42 = vmul.f32 %v2473_v19, %v1454_v60 }
 0x25f   :  { %v2475_v20 = vpop.eup %2474 }
 0x260   :  { %v2477_v21 = vpop.eup %2476  ;;  %v1506_v23 = vmul.f32 %v2475_v20, %v1456_v3 }
 0x261   :  { %v2479_v22 = vpop.eup %2478  ;;  %v1502_v45 = vmul.f32 %v2477_v21, %v1452_v55 }
 0x262   :  { %v1507_v24 = vmul.f32 %v2479_v22, %v1458_v2 }
 0x263   :  { %v1510_v28 = vpack.c.bf16 %v1506_v23, %v1502_v45 }
 0x264   :  { %v1511_v25 = vpack.c.bf16 %v1507_v24, %v1503_v42 }
 0x266   :  { %1848 = vmatprep.mubr.bf16.mxu1 %v1511_v25 }
 0x267   :  { %1849 = vmatmul.mubr.bf16.vlgmr.msra.gmra.mxu1 %v1510_v28 }
 0x2e7   :  { %v2105_v29 = vpop.f32.mrf.mxu0 }
 0x2e9   :  { %v2106_v30 = vpop.f32.mrf.mxu0 }
 0x2ea   :  { %v2107_v14 = vadd.f32 %v2106_v30, %v2105_v29 }
 0x2eb   :  { %v2108_v31 = vpop.f32.mrf.mxu0 }
 0x2ec   :  { %v1810_v39 = vadd.f32 %v2107_v14, %v2047_v35 }
 0x2ed   :  { %v2109_v34 = vpop.f32.mrf.mxu0 }
 0x2ee   :  { %v2110_v27 = vadd.f32 %v2109_v34, %v2108_v31 }
 0x2f0   :  { %v1813_v40 = vadd.f32 %v2110_v27, %v2047_v35 }
 0x327   :  { %v2127_v26 = vpop.f32.mrf.mxu1 }
 0x329   :  { %v2128_v13 = vpop.f32.mrf.mxu1 }
 0x32a   :  { %v2129_v37 = vadd.f32 %v2128_v13, %v2127_v26 }
 0x32b   :  { %v2130_v36 = vpop.f32.mrf.mxu1 }
 0x32c   :  { %v1851_v33 = vadd.f32 %v2129_v37, %v1810_v39 }
 0x32d   :  { %v2131_v38 = vpop.f32.mrf.mxu1 }
 0x32e   :  { %v2132_v32 = vadd.f32 %v2131_v38, %v2130_v36 }
 0x330   :  { %v1854_v41 = vadd.f32 %v2132_v32, %v1813_v40 }
 0x332   :  { %v2087_v44 = vpack.c.bf16 %v1854_v41, %v1851_v33 }
 0x334   :  { %2088 = vst [vmem:[#allocation7] sm:$0xff] %v2087_v44  }
 0x335   :  { %2531 = shalt.err (!%p2528_p0)
}
 0x336   :  { %1878 = dma.vmem_to_hbm [thread:$0]  %s1873_s25, 128, %s2783_s8, [#allocation4], %s2550_s15, %s2550_s15, %s2551_s16  }
 0x337   :  { %2544 = dma.done.wait [#allocation4], 128  }
 0x338   :  { %2545 = vsyncadd [#allocation4], 4294967168 }
 0x339   :  { %1882 = vsyncpa [#allocation3], 1 }
 0x33a   :  { %1883 = vsyncpa [#allocation6], 1 }
 0x33b   :  { %1884 = vsyncpa [#allocation4], 1 }

</bundles_post_ra>
